<compile_context>
chip_gen: v7x
topology: tpu7x:2x2x1
jax: 0.10.0
libtpu: 0.0.40
codegen_flags: <defaults>
</compile_context>

<pallas_src>
import jax
import jax.numpy as jnp
from jax.experimental import pallas as pl
from jax.experimental.pallas import tpu as pltpu


def _round_up(x, m):
    return (x + m - 1) // m * m


def _cdiv(a, b):
    return (a + b - 1) // b


# ----------------------------------------------------------------------------
# Fused forward kernel: whole network for one row-tile of the batch.
#   h1  = relu(x @ W1 + b1)        (folded embeddings + fc + selector Linear 1)
#   out = h1 @ W2 + b2             (selector Linear 2)
# ----------------------------------------------------------------------------
def _actor_fused_kernel(x_ref, w1_ref, b1_ref, w2_ref, b2_ref, out_ref):
    f32 = jnp.float32
    h1 = jnp.maximum(
        jnp.dot(x_ref[...], w1_ref[...], preferred_element_type=f32)
        + b1_ref[...],
        0.0)
    out_ref[...] = (jnp.dot(h1.astype(w2_ref.dtype), w2_ref[...],
                            preferred_element_type=f32)
                    + b2_ref[...])


# ----------------------------------------------------------------------------
# Raw parameters (PyTorch-default-style uniform init; w stored as [in, out]).
# ----------------------------------------------------------------------------
def init_actor_params(key, d_node, d_task, max_tasks, m1, m2, d_model):
    L1 = m1 * max_tasks
    dims = {
        "tn": (d_node, d_model),
        "td": (d_task, d_model),
        "cn": (d_node, d_model),
        "fc": (d_model * (L1 + m2), 4 * d_model),
        "s1": (4 * d_model, 2 * d_model),
        "s2": (2 * d_model, (m2 + 1) * L1),
    }
    params = {}
    for name, (fan_in, fan_out) in dims.items():
        key, kw, kb = jax.random.split(key, 3)
        bound = 1.0 / (fan_in ** 0.5)
        params["w_" + name] = jax.random.uniform(
            kw, (fan_in, fan_out), jnp.float32, -bound, bound)
        params["b_" + name] = jax.random.uniform(
            kb, (1, fan_out), jnp.float32, -bound, bound)
    return params


# ----------------------------------------------------------------------------
# One-time packing: fold the whole affine prefix, lane-pad, cast to bf16.
# ----------------------------------------------------------------------------
def pack_actor_params(raw, d_node, d_task, max_tasks, m1, m2, d_model):
    L1 = m1 * max_tasks
    h1_dim = 2 * d_model
    n_out = (m2 + 1) * L1

    # fc weight viewed per sequence position p: Wfc[p] : [d_model, 4*d_model]
    wfc = raw["w_fc"].reshape(L1 + m2, d_model, 4 * d_model)
    wfc_task = wfc[:L1]                                   # [L1, d_model, 4dm]
    wfc_cn = wfc[L1:]                                     # [m2, d_model, 4dm]
    w_s1 = raw["w_s1"]                                    # [4dm, 2dm]

    # Fold embeddings -> fc -> s1 (all affine, f32 fold done once off-line).
    W_task = jnp.einsum("dk,pkh,hq->pdq", raw["w_td"], wfc_task, w_s1)
    W_task = W_task.reshape(L1 * d_task, h1_dim)
    # each task-node slot i feeds every one of its max_tasks positions
    wfc_tn = wfc_task.reshape(m1, max_tasks, d_model, 4 * d_model).sum(axis=1)
    W_tn = jnp.einsum("dk,ikh,hq->idq", raw["w_tn"], wfc_tn, w_s1)
    W_tn = W_tn.reshape(m1 * d_node, h1_dim)
    W_cn = jnp.einsum("dk,jkh,hq->jdq", raw["w_cn"], wfc_cn, w_s1)
    W_cn = W_cn.reshape(m2 * d_node, h1_dim)

    # fused bias (all embedding / fc / s1 biases propagated through)
    b_seq = ((raw["b_td"][0] + raw["b_tn"][0]) @ wfc_task.sum(axis=0)
             + raw["b_cn"][0] @ wfc_cn.sum(axis=0)
             + raw["b_fc"][0])                            # [4dm]
    b1 = (b_seq @ w_s1 + raw["b_s1"][0])[None, :]         # [1, 2dm]

    # single fused input weight + lane-dense 128-padding everywhere
    d_in = L1 * d_task + m1 * d_node + m2 * d_node
    d_in_pad = _round_up(d_in, 128)
    h1_pad = _round_up(h1_dim, 128)
    n_out_pad = _round_up(n_out, 128)

    w1 = jnp.concatenate([W_task, W_tn, W_cn], axis=0)    # [d_in, 2dm]
    w1 = jnp.pad(w1, ((0, d_in_pad - d_in), (0, h1_pad - h1_dim)))
    b1 = jnp.pad(b1, ((0, 0), (0, h1_pad - h1_dim)))
    w2 = jnp.pad(raw["w_s2"], ((0, h1_pad - h1_dim), (0, n_out_pad - n_out)))
    b2 = jnp.pad(raw["b_s2"], ((0, 0), (0, n_out_pad - n_out)))

    # bf16 MXU operands; biases stay f32 (bias add / ReLU done in f32).
    return dict(w1=w1.astype(jnp.bfloat16), b1=b1,
                w2=w2.astype(jnp.bfloat16), b2=b2)


# ----------------------------------------------------------------------------
# Forward wrapper (single fused pallas_call, batch rows tiled on the grid).
# ----------------------------------------------------------------------------
@jax.jit
def actor_forward(packed, task_node, task_data, compute_node,
                  task_mask, compute_node_mask):
    # task_mask / compute_node_mask are accepted but unused, matching the
    # reference PyTorch forward which never reads them.
    B, m1, d_node = task_node.shape
    max_tasks, d_task = task_data.shape[2], task_data.shape[3]
    m2 = compute_node.shape[1]
    L1 = m1 * max_tasks
    n_out = (m2 + 1) * L1
    d_in = L1 * d_task + m1 * d_node + m2 * d_node
    d_in_pad = packed["w1"].shape[0]
    n_out_pad = packed["w2"].shape[1]

    # one lane-padded bf16 activation stream -> one input DMA per tile
    x = jnp.concatenate([task_data.reshape(B, L1 * d_task),
                         task_node.reshape(B, m1 * d_node),
                         compute_node.reshape(B, m2 * d_node)], axis=1)
    x = jnp.pad(x, ((0, 0), (0, d_in_pad - d_in))).astype(jnp.bfloat16)

    # Row tiling: big tiles (amortize per-grid-step overhead), >=2 tiles when
    # the batch allows (both v7x TensorCores), balanced near-divisor tb so
    # padding costs less than one tile; 16-row alignment for bf16 sublanes.
    target = 2048
    n_tiles = _cdiv(B, target)
    if B >= 32:
        n_tiles = max(n_tiles, 2)
    tb = _round_up(_cdiv(B, n_tiles), 16)
    b_pad = _round_up(B, tb)
    if b_pad != B:
        x = jnp.pad(x, ((0, b_pad - B), (0, 0)))

    weights = (packed["w1"], packed["b1"], packed["w2"], packed["b2"])
    in_specs = ([pl.BlockSpec((tb, d_in_pad), lambda i: (i, 0))]
                + [pl.BlockSpec(w.shape, lambda i: (0, 0)) for w in weights])

    score_pad = pl.pallas_call(
        _actor_fused_kernel,
        grid=(b_pad // tb,),
        in_specs=in_specs,
        out_specs=pl.BlockSpec((tb, n_out_pad), lambda i: (i, 0)),
        out_shape=jax.ShapeDtypeStruct((b_pad, n_out_pad), jnp.float32),
        compiler_params=pltpu.CompilerParams(
            dimension_semantics=("parallel",),
            vmem_limit_bytes=32 * 1024 * 1024),
    )(x, *weights)

    return score_pad[:B, :n_out].reshape(B, L1, m2 + 1)


# ----------------------------------------------------------------------------
# Pure-JAX reference (mirrors the PyTorch forward exactly, uses raw params)
# ----------------------------------------------------------------------------
def reference_forward(raw, task_node, task_data, compute_node):
    B, m1, _ = task_node.shape
    max_tasks = task_data.shape[2]
    m2 = compute_node.shape[1]
    d_model = raw["w_tn"].shape[1]
    tn_emb = task_node @ raw["w_tn"] + raw["b_tn"][0]
    td_emb = task_data @ raw["w_td"] + raw["b_td"][0]
    combined = tn_emb[:, :, None, :] + td_emb
    task_seq = combined.reshape(B, m1 * max_tasks, d_model)
    cn_emb = compute_node @ raw["w_cn"] + raw["b_cn"][0]
    seq = jnp.concatenate([task_seq, cn_emb], axis=1).reshape(B, -1)
    h = seq @ raw["w_fc"] + raw["b_fc"][0]
    h1 = jnp.maximum(h @ raw["w_s1"] + raw["b_s1"][0], 0.0)
    score = h1 @ raw["w_s2"] + raw["b_s2"][0]
    return score.reshape(B, m1 * max_tasks, m2 + 1)


if __name__ == "__main__":
    # Small, forward-consistent shapes.
    B, d_node, d_task, max_tasks, m1, m2, d_model = 2, 8, 6, 4, 3, 5, 32

    key = jax.random.PRNGKey(0)
    kp, k1, k2, k3, k4, k5 = jax.random.split(key, 6)
    raw = init_actor_params(kp, d_node, d_task, max_tasks, m1, m2, d_model)
    packed = pack_actor_params(raw, d_node, d_task, max_tasks, m1, m2, d_model)

    task_node = jax.random.normal(k1, (B, m1, d_node), jnp.float32)
    task_data = jax.random.normal(k2, (B, m1, max_tasks, d_task), jnp.float32)
    compute_node = jax.random.normal(k3, (B, m2, d_node), jnp.float32)
    task_mask = (jax.random.uniform(k4, (B, m1, max_tasks)) > 0.3).astype(jnp.float32)
    compute_node_mask = (jax.random.uniform(k5, (B, m2)) > 0.3).astype(jnp.float32)

    out = actor_forward(packed, task_node, task_data, compute_node,
                        task_mask, compute_node_mask)
    out = jax.block_until_ready(out)

    ref = reference_forward(raw, task_node, task_data, compute_node)
    assert out.shape == (B, m1 * max_tasks, m2 + 1), out.shape
    # bf16 matmul operands with f32 accumulation -> looser tolerance than f32.
    assert jnp.allclose(out, ref, atol=2e-2, rtol=2e-2), \
        float(jnp.max(jnp.abs(out - ref)))
    print("KERNEL_OK")
</pallas_src>

<mosaic_0001>
module attributes {stable_mosaic.version = 11 : i64} {
  func.func @_actor_fused_kernel(%arg0: i32, %arg1: memref<16x256xbf16, #tpu.memory_space<vmem>>, %arg2: memref<256x128xbf16, #tpu.memory_space<vmem>>, %arg3: memref<1x128xf32, #tpu.memory_space<vmem>>, %arg4: memref<128x128xbf16, #tpu.memory_space<vmem>>, %arg5: memref<1x128xf32, #tpu.memory_space<vmem>>, %arg6: memref<16x128xf32, #tpu.memory_space<vmem>>) attributes {dimension_semantics = [#tpu.dimension_semantics<parallel>], iteration_bounds = array<i64: 1>, scalar_prefetch = 0 : i64, scratch_operands = 0 : i64, tpu.core_type = #tpu.core_type<tc>, window_params = [{transform_indices = @transform_0, window_bounds = array<i64: 16, 256>}, {pipeline_mode = #tpu.pipeline_mode<synchronous>, transform_indices = @transform_1, window_bounds = array<i64: 256, 128>}, {pipeline_mode = #tpu.pipeline_mode<synchronous>, transform_indices = @transform_2, window_bounds = array<i64: 1, 128>}, {pipeline_mode = #tpu.pipeline_mode<synchronous>, transform_indices = @transform_3, window_bounds = array<i64: 128, 128>}, {pipeline_mode = #tpu.pipeline_mode<synchronous>, transform_indices = @transform_4, window_bounds = array<i64: 1, 128>}, {transform_indices = @transform_5, window_bounds = array<i64: 16, 128>}]} {
    %c0 = arith.constant 0 : index
    %c0_0 = arith.constant 0 : index
    %0 = vector.load %arg1[%c0, %c0_0] : memref<16x256xbf16, #tpu.memory_space<vmem>>, vector<16x256xbf16>
    %c0_1 = arith.constant 0 : index
    %c0_2 = arith.constant 0 : index
    %1 = vector.load %arg2[%c0_1, %c0_2] : memref<256x128xbf16, #tpu.memory_space<vmem>>, vector<256x128xbf16>
    %cst = arith.constant dense<0.000000e+00> : vector<16x128xf32>
    %2 = tpu.matmul %0, %1, %cst {dimension_numbers = #tpu.dot_dimension_numbers<[1], [0], [0], [1], [0, 0, 1, 1], [], []>} : vector<16x256xbf16>, vector<256x128xbf16>, vector<16x128xf32> -> vector<16x128xf32>
    %c0_3 = arith.constant 0 : index
    %c0_4 = arith.constant 0 : index
    %3 = vector.load %arg3[%c0_3, %c0_4] : memref<1x128xf32, #tpu.memory_space<vmem>>, vector<1x128xf32>
    %4 = vector.broadcast %3 : vector<1x128xf32> to vector<16x128xf32>
    %5 = arith.addf %2, %4 : vector<16x128xf32>
    %cst_5 = arith.constant 0.000000e+00 : f32
    %6 = vector.broadcast %cst_5 : f32 to vector<16x128xf32>
    %7 = arith.maximumf %5, %6 : vector<16x128xf32>
    %8 = arith.truncf %7 : vector<16x128xf32> to vector<16x128xbf16>
    %c0_6 = arith.constant 0 : index
    %c0_7 = arith.constant 0 : index
    %9 = vector.load %arg4[%c0_6, %c0_7] : memref<128x128xbf16, #tpu.memory_space<vmem>>, vector<128x128xbf16>
    %cst_8 = arith.constant dense<0.000000e+00> : vector<16x128xf32>
    %10 = tpu.matmul %8, %9, %cst_8 {dimension_numbers = #tpu.dot_dimension_numbers<[1], [0], [0], [1], [0, 0, 1, 1], [], []>} : vector<16x128xbf16>, vector<128x128xbf16>, vector<16x128xf32> -> vector<16x128xf32>
    %c0_9 = arith.constant 0 : index
    %c0_10 = arith.constant 0 : index
    %11 = vector.load %arg5[%c0_9, %c0_10] : memref<1x128xf32, #tpu.memory_space<vmem>>, vector<1x128xf32>
    %12 = vector.broadcast %11 : vector<1x128xf32> to vector<16x128xf32>
    %13 = arith.addf %10, %12 : vector<16x128xf32>
    %c0_11 = arith.constant 0 : index
    %c0_12 = arith.constant 0 : index
    %14 = vector.load %arg6[%c0_11, %c0_12] : memref<16x128xf32, #tpu.memory_space<vmem>>, vector<16x128xf32>
    tpu.vector_store %arg6[%c0_11, %c0_12], %13 {strides = array<i32>} : memref<16x128xf32, #tpu.memory_space<vmem>>, vector<16x128xf32>,
    return
  }
  func.func @transform_0(%arg0: i32) -> (i32, i32) {
    %c0_i32 = arith.constant 0 : i32
    %c0_i32_0 = arith.constant 0 : i32
    return %arg0, %c0_i32 : i32, i32
  }
  func.func @transform_1(%arg0: i32) -> (i32, i32) {
    %c0_i32 = arith.constant 0 : i32
    %c0_i32_0 = arith.constant 0 : i32
    %c0_i32_1 = arith.constant 0 : i32
    return %c0_i32, %c0_i32_0 : i32, i32
  }
  func.func @transform_2(%arg0: i32) -> (i32, i32) {
    %c0_i32 = arith.constant 0 : i32
    %c0_i32_0 = arith.constant 0 : i32
    %c0_i32_1 = arith.constant 0 : i32
    return %c0_i32, %c0_i32_0 : i32, i32
  }
  func.func @transform_3(%arg0: i32) -> (i32, i32) {
    %c0_i32 = arith.constant 0 : i32
    %c0_i32_0 = arith.constant 0 : i32
    %c0_i32_1 = arith.constant 0 : i32
    return %c0_i32, %c0_i32_0 : i32, i32
  }
  func.func @transform_4(%arg0: i32) -> (i32, i32) {
    %c0_i32 = arith.constant 0 : i32
    %c0_i32_0 = arith.constant 0 : i32
    %c0_i32_1 = arith.constant 0 : i32
    return %c0_i32, %c0_i32_0 : i32, i32
  }
  func.func @transform_5(%arg0: i32) -> (i32, i32) {
    %c0_i32 = arith.constant 0 : i32
    %c0_i32_0 = arith.constant 0 : i32
    return %arg0, %c0_i32 : i32, i32
  }
}

</mosaic_0001>

<bundles_post_ra>
// kernel: actor_forward.1
= control target key start
LH: loop header
LB: loop body
LE: loop exit
PB: predicated region body
PF: predicated region fallthrough
CT: control target
= control target key end

     0   :  { %10 = vsyncpa [#allocation3], 0  ;;  %s480_s18 = smov [#allocation2]   ;;  %s593_s0 = inlined_call_operand.vmem [shape: bf16[16,256], index: 0, kind: input, shape index: {}]   ;;  %s594_s1 = inlined_call_operand.vmem [shape: bf16[256,128], index: 1, kind: input, shape index: {}]   ;;  %s595_s2 = inlined_call_operand.vmem [shape: f32[1,128], index: 2, kind: input, shape index: {}]   ;;  %s596_s3 = inlined_call_operand.hbm [shape: bf16[128,128], index: 3, kind: input, shape index: {}]   ;;  %s597_s4 = inlined_call_operand.vmem [shape: f32[1,128], index: 4, kind: input, shape index: {}]   ;;  %s598_s5 = inlined_call_operand.vmem [shape: f32[16,128], index: 5, kind: output, shape index: {}]  }
   0x1   :  { %s22_s19 = sshll.u32 %s480_s18, 4  ;;  %s456_s22 = scalar_lea.hbm %s596_s3, 1024  ;;  %s23_s19 = int_to_ptr.vmem [resolvable:$true] %s22_s19 }
   0x2   :  { %p457_p0 = scmp.ne.s32.totalorder %s596_s3, %s456_s22  ;;  %p460_p1 = scmp.lt.u32.totalorder %s456_s22, %s596_s3 }
   0x4   :  { %p462_p2 = pnand %p460_p1, %p457_p0 }
   0x6   :  { %465 = shalt.err (!%p462_p2)
}
   0x7   :  { %s466_s27 = scalar_lea.vmem %s23_s19, 1024  ;;  %p471_p4 = scmp.lt.s32.totalorder %s23_s19, %s23_s19 }
   0x8   :  { %p467_p3 = scmp.ne.s32.totalorder %s23_s19, %s466_s27  ;;  %p472_p5 = scmp.lt.s32.totalorder %s466_s27, %s466_s27 }
   0xa   :  { %p473_p6 = por %p472_p5, %p471_p4 }
   0xc   :  { %p474_p7 = pnand %p473_p6, %p467_p3 }
   0xe   :  { %477 = shalt.err (!%p474_p7)
}
   0xf   :  { %s481_s28 = smov 64   ;;  %s482_s29 = smov 4  }
  0x10   :  { %28 = dma.hbm_to_vmem [thread:$0]  %s596_s3, 1024, %s23_s19, [#allocation3], %s481_s28, %s481_s28, %s482_s29  }
  0x11   :  { %478 = dma.done.wait [#allocation3], 1024  }
  0x12   :  { %479 = vsyncadd [#allocation3], 4294966272  ;;  %v483_v0 = vmov 0.0   ;;  %v429_v1 = vld [vmem:[%s594_s1 + $0x40] sm:$0xff]   ;;  %v431_v3 = vld [vmem:[%s594_s1 + $0x48] sm:$0xff]   ;;  %vm484_vm0 = vmmov 0  }
  0x13   :  { %404 = vmatprep.subr.bf16.mxu1 %v483_v0  ;;  %v430_v2 = vld [vmem:[%s594_s1] sm:$0xff]   ;;  %373 = vmatprep.subr.bf16.mxu0 %v429_v1  ;;  %v432_v4 = vld [vmem:[%s594_s1 + $0x8] sm:$0xff]   ;;  %v433_v5 = vld [vmem:[%s594_s1 + $0x50] sm:$0xff]  }
  0x14   :  { %374 = vmatpush3.bf16.msra.mxu0 %v430_v2  ;;  %v434_v6 = vld [vmem:[%s594_s1 + $0x10] sm:$0xff]   ;;  %v435_v7 = vld [vmem:[%s594_s1 + $0x58] sm:$0xff]   ;;  %v437_v9 = vld [vmem:[%s594_s1 + $0x60] sm:$0xff]   ;;  %420 = vmatprep.mubr.msk.bf16.mxu1 %vm484_vm0, %v483_v0 }
  0x15   :  { %375 = vmatprep.subr.bf16.mxu0 %v431_v3  ;;  %v436_v8 = vld [vmem:[%s594_s1 + $0x18] sm:$0xff]   ;;  %v438_v10 = vld [vmem:[%s594_s1 + $0x20] sm:$0xff]   ;;  %v439_v11 = vld [vmem:[%s594_s1 + $0x68] sm:$0xff]  }
  0x16   :  { %v440_v12 = vld [vmem:[%s594_s1 + $0x28] sm:$0xff]   ;;  %v448_v14 = vld [vmem:[#allocation2] sm:$0xff]   ;;  %v441_v15 = vld [vmem:[%s594_s1 + $0x70] sm:$0xff]  }
  0x17   :  { %v447_v13 = vld [vmem:[%s593_s0 + $0x4] ss:$8 sps:$4 sm:$0xff]   ;;  %405 = vmatpush3.bf16.msra.mxu1 %v448_v14  ;;  %v442_v17 = vld [vmem:[%s594_s1 + $0x30] sm:$0xff]   ;;  %v443_v18 = vld [vmem:[%s594_s1 + $0x78] sm:$0xff]  }
  0x18   :  { %376 = vmatpush3.bf16.msra.mxu0 %v432_v4  ;;  %214 = vmatprep.mubr.bf16.mxu0 %v447_v13  ;;  %v449_v16 = vld [vmem:[#allocation2 + $0x8] sm:$0xff]   ;;  %v450_v19 = vld [vmem:[#allocation2 + $0x10] sm:$0xff]   ;;  %v444_v20 = vld [vmem:[%s594_s1 + $0x38] sm:$0xff]  }
  0x19   :  { %377 = vmatprep.subr.bf16.mxu0 %v433_v5  ;;  %406 = vmatprep.subr.bf16.mxu1 %v483_v0  ;;  %v451_v21 = vld [vmem:[#allocation2 + $0x18] sm:$0xff]   ;;  %v445_v22 = vld [vmem:[%s593_s0] ss:$8 sps:$4 sm:$0xff]   ;;  %v454_v25 = vld [vmem:[#allocation2 + $0x30] sm:$0xff]  }
  0x1a   :  { %v452_v23 = vld [vmem:[#allocation2 + $0x20] sm:$0xff]   ;;  %v453_v24 = vld [vmem:[#allocation2 + $0x28] sm:$0xff]   ;;  %v455_v26 = vld [vmem:[#allocation2 + $0x38] sm:$0xff]  }
  0x1b   :  { %407 = vmatpush3.bf16.msra.mxu1 %v449_v16  ;;  %v345_v28 = vld [vmem:[%s595_s2] ss:$0 sm:$0xff] }
  0x1c   :  { %378 = vmatpush3.bf16.msra.mxu0 %v434_v6  ;;  %408 = vmatprep.subr.bf16.mxu1 %v483_v0  ;;  %v364_v39 = vld [vmem:[%s597_s4] ss:$0 sm:$0xff] }
  0x1d   :  { %379 = vmatprep.subr.bf16.mxu0 %v435_v7 }
  0x1f   :  { %409 = vmatpush3.bf16.msra.mxu1 %v450_v19 }
  0x20   :  { %380 = vmatpush3.bf16.msra.mxu0 %v436_v8  ;;  %410 = vmatprep.subr.bf16.mxu1 %v483_v0 }
  0x21   :  { %381 = vmatprep.subr.bf16.mxu0 %v437_v9 }
  0x23   :  { %411 = vmatpush3.bf16.msra.mxu1 %v451_v21 }
  0x24   :  { %382 = vmatpush3.bf16.msra.mxu0 %v438_v10  ;;  %412 = vmatprep.subr.bf16.mxu1 %v483_v0 }
  0x25   :  { %383 = vmatprep.subr.bf16.mxu0 %v439_v11 }
  0x27   :  { %413 = vmatpush3.bf16.msra.mxu1 %v452_v23 }
  0x28   :  { %384 = vmatpush3.bf16.msra.mxu0 %v440_v12  ;;  %414 = vmatprep.subr.bf16.mxu1 %v483_v0 }
  0x29   :  { %385 = vmatprep.subr.bf16.mxu0 %v441_v15 }
  0x2b   :  { %415 = vmatpush3.bf16.msra.mxu1 %v453_v24 }
  0x2c   :  { %386 = vmatpush3.bf16.msra.mxu0 %v442_v17  ;;  %416 = vmatprep.subr.bf16.mxu1 %v483_v0 }
  0x2d   :  { %387 = vmatprep.subr.bf16.mxu0 %v443_v18 }
  0x2f   :  { %417 = vmatpush3.bf16.msra.mxu1 %v454_v25 }
  0x30   :  { %388 = vmatpush3.bf16.msra.mxu0 %v444_v20  ;;  %418 = vmatprep.subr.bf16.mxu1 %v483_v0 }
  0x33   :  { %215 = vmatmul.mubr.bf16.vlgmr.msra.gmra.mrb[0].mxu0 %v445_v22  ;;  %419 = vmatpush3.bf16.msra.mxu1 %v455_v26 }
 0x106   :  { %v389_v27 = vpop.f32.mrb[0].mxu0 }
 0x107   :  { %v390_v29 = vpop.f32.mrb[1].mxu0 }
 0x108   :  { %v391_v30 = vadd.f32 %v390_v29, %v389_v27  ;;  %v392_v31 = vpop.f32.mrb[2].mxu0 }
 0x109   :  { %v393_v32 = vpop.f32.mrb[3].mxu0 }
 0x10a   :  { %v217_v33 = vadd.f32 %v391_v30, %v345_v28  ;;  %v394_v34 = vadd.f32 %v393_v32, %v392_v31 }
 0x10c   :  { %v220_v35 = vadd.f32 %v394_v34, %v345_v28  ;;  %v223_v36 = vmax.f32 %v217_v33, 0.0 }
 0x10e   :  { %v224_v37 = vmax.f32 %v220_v35, 0.0 }
 0x110   :  { %v225_v38 = vpack.c.bf16 %v224_v37, %v223_v36 }
 0x112   :  { %421 = vmatmul.mubr.bf16.vlgmr.msra.gmra.mrb[0].mxu1 %v225_v38 }
 0x1e5   :  { %v331_v40 = vpop.f32.mrb[0].mxu1 }
 0x1e6   :  { %v332_v41 = vadd.f32 %v364_v39, %v331_v40  ;;  %v422_v42 = vpop.f32.mrb[1].mxu1 }
 0x1e7   :  { %v334_v43 = vpop.f32.mrb[2].mxu1 }
 0x1e8   :  { %338 = vst [vmem:[%s598_s5] sm:$0xff] %v332_v41  ;;  %v335_v44 = vadd.f32 %v364_v39, %v334_v43  ;;  %v423_v45 = vpop.f32.mrb[3].mxu1 }
 0x1ea   :  { %339 = vst [vmem:[%s598_s5 + $0x8] sm:$0xff] %v335_v44 }
 0x1eb   :  { %344 = vsyncpa [#allocation3], 1 }

</bundles_post_ra>
